<compile_context>
chip_gen: v5e
topology: v5e:2x2
jax: 0.10.0
libtpu: 0.0.40
codegen_flags: <defaults>
</compile_context>

<pallas_src>
import jax
import jax.numpy as jnp
from jax.experimental import pallas as pl
from jax.experimental.pallas import tpu as pltpu


def _make_resblock_kernel(H, W, halo, eps=1e-5):
    HW = H * W

    def kernel(x_ref, w1_ref, w2_ref, o_ref, buf_ref):
        # x_ref : (Cp, HW)                 lane-dense input image (flat spatial)
        # w1/w2 : (3, Cp, 3*Cp)            per-dx weight slabs, [kx, out, ky*Cp+in]
        # o_ref : (Cp, HW)                 lane-dense output slab
        # buf_ref: (3*Cp, HW + 2*halo)     3 dy-shifted copies of the activation
        Cp = x_ref.shape[0]
        inv_hw = 1.0 / HW

        # Horizontal-edge masks (flat dx shifts wrap across row boundaries).
        # Applied once per dx partial sum AFTER the matmul — exact, because the
        # contraction never mixes spatial columns.
        col = jax.lax.broadcasted_iota(jnp.int32, (Cp, HW), 1) % W
        left_edge = col == 0            # invalid output cols for dx == -1
        right_edge = col == (W - 1)     # invalid output cols for dx == +1

        def stage_in(act):
            # Write the activation into the three dy-shifted sublane blocks:
            # block k holds act position p at lane halo + p - (k-1)*W.
            buf_ref[0 * Cp:1 * Cp, halo + W:halo + W + HW] = act   # dy = -1
            buf_ref[1 * Cp:2 * Cp, halo:halo + HW] = act           # dy =  0 (aligned)
            buf_ref[2 * Cp:3 * Cp, halo - W:halo - W + HW] = act   # dy = +1

        def conv3x3(w_ref):
            # One (Cp, 3Cp) @ (3Cp, HW) MXU contraction per horizontal tap dx;
            # vertical zero-padding comes from the scratch halo for free.
            a_m1 = jnp.dot(w_ref[0], buf_ref[:, halo - 1:halo - 1 + HW],
                           preferred_element_type=jnp.float32)
            a_0 = jnp.dot(w_ref[1], buf_ref[:, halo:halo + HW],
                          preferred_element_type=jnp.float32)
            a_p1 = jnp.dot(w_ref[2], buf_ref[:, halo + 1:halo + 1 + HW],
                           preferred_element_type=jnp.float32)
            return (a_0
                    + jnp.where(left_edge, 0.0, a_m1)
                    + jnp.where(right_edge, 0.0, a_p1))

        def inorm(y):
            # Fused single-pass instance norm over the lane-dense spatial axis.
            s = jnp.sum(y, axis=-1, keepdims=True)
            ss = jnp.sum(y * y, axis=-1, keepdims=True)
            m = s * inv_hw
            var = ss * inv_hw - m * m
            return (y - m) * jax.lax.rsqrt(var + eps)

        # Zero only the tiny halo gaps around the interiors once per step
        # (scratch persists across grid steps; data regions are always fully
        # rewritten before being read, so this stays correct under "parallel"
        # batch sharding with per-core scratch).
        zero_gap = jnp.zeros((3 * Cp, 2 * W), jnp.float32)
        buf_ref[:, halo - W:halo + W] = zero_gap
        buf_ref[:, halo + HW - W:halo + HW + W] = zero_gap

        x = x_ref[...]          # single load; reused for the residual add

        # stage 1: conv1 -> InstanceNorm -> ReLU
        stage_in(x)
        h = jnp.maximum(inorm(conv3x3(w1_ref)), 0.0)

        # stage 2: conv2 -> InstanceNorm -> + residual -> ReLU
        stage_in(h)
        y = inorm(conv3x3(w2_ref))
        o_ref[...] = jnp.maximum(y + x, 0.0)

    return kernel


def residual_block(x, w1, w2):
    """x: (N, C, H, W) f32; w1, w2: (C, C, 3, 3) f32 (PyTorch OIHW, bias=False)."""
    N, C, H, W = x.shape
    HW = H * W
    Cp = ((C + 7) // 8) * 8                 # sublane-align channel count
    halo = ((W + 127) // 128) * 128         # lane-aligned halo, >= W

    # Lane-dense (N, C, HW) layout; pad channels with zeros (sliced off later).
    xf = x.reshape(N, C, HW)
    if Cp != C:
        xf = jnp.pad(xf, ((0, 0), (0, Cp - C), (0, 0)))

    def prep_w(w):
        # OIHW -> (kx, out, ky, in); contraction dim laid out ky-major, in-minor
        # to match the dy-block ordering of the replicated scratch buffer.
        wt = jnp.transpose(w, (3, 0, 2, 1))            # (kx, O, ky, I)
        if Cp != C:
            wt = jnp.pad(wt, ((0, 0), (0, Cp - C), (0, 0), (0, Cp - C)))
        return wt.reshape(3, Cp, 3 * Cp)

    kernel = _make_resblock_kernel(H, W, halo)

    out = pl.pallas_call(
        kernel,
        out_shape=jax.ShapeDtypeStruct((N, Cp, HW), jnp.float32),
        grid=(N,),
        in_specs=[
            pl.BlockSpec((None, Cp, HW), lambda n: (n, 0, 0)),
            pl.BlockSpec((3, Cp, 3 * Cp), lambda n: (0, 0, 0)),
            pl.BlockSpec((3, Cp, 3 * Cp), lambda n: (0, 0, 0)),
        ],
        out_specs=pl.BlockSpec((None, Cp, HW), lambda n: (n, 0, 0)),
        scratch_shapes=[pltpu.VMEM((3 * Cp, HW + 2 * halo), jnp.float32)],
        compiler_params=pltpu.CompilerParams(
            dimension_semantics=("parallel",)),
    )(xf, prep_w(w1), prep_w(w2))

    return out[:, :C, :].reshape(N, C, H, W)


def _reference(x, w1, w2):
    """Pure-JAX reference matching the PyTorch forward."""
    def conv(a, w):
        return jax.lax.conv_general_dilated(
            a, w, window_strides=(1, 1), padding=((1, 1), (1, 1)),
            dimension_numbers=("NCHW", "OIHW", "NCHW"))

    def inorm(y):
        m = y.mean(axis=(2, 3), keepdims=True)
        v = ((y - m) ** 2).mean(axis=(2, 3), keepdims=True)
        return (y - m) * jax.lax.rsqrt(v + 1e-5)

    h = jax.nn.relu(inorm(conv(x, w1)))
    h = inorm(conv(h, w2))
    return jax.nn.relu(h + x)


if __name__ == "__main__":
    key = jax.random.PRNGKey(0)
    k1, k2, k3 = jax.random.split(key, 3)

    N, C, H, W = 2, 4, 16, 16
    x = jax.random.normal(k1, (N, C, H, W), jnp.float32)
    # deterministic synthetic conv weights (Conv2d has bias=False in the module)
    w1 = 0.2 * jax.random.normal(k2, (C, C, 3, 3), jnp.float32)
    w2 = 0.2 * jax.random.normal(k3, (C, C, 3, 3), jnp.float32)

    out = jax.block_until_ready(residual_block(x, w1, w2))
    ref = _reference(x, w1, w2)

    assert out.shape == (N, C, H, W)
    assert jnp.allclose(out, ref, atol=2e-4, rtol=2e-4), "mismatch vs reference"
    print("KERNEL_OK")
</pallas_src>

<mosaic_0001>
module attributes {stable_mosaic.version = 11 : i64} {
  func.func @kernel(%arg0: i32, %arg1: memref<1x8x256xf32, #tpu.memory_space<vmem>>, %arg2: memref<3x8x24xf32, #tpu.memory_space<vmem>>, %arg3: memref<3x8x24xf32, #tpu.memory_space<vmem>>, %arg4: memref<1x8x256xf32, #tpu.memory_space<vmem>>, %arg5: memref<24x512xf32, #tpu.memory_space<vmem>>) attributes {dimension_semantics = [#tpu.dimension_semantics<parallel>], iteration_bounds = array<i64: 2>, scalar_prefetch = 0 : i64, scratch_operands = 1 : i64, tpu.core_type = #tpu.core_type<tc>, window_params = [{transform_indices = @transform_0, window_bounds = array<i64: 1, 8, 256>}, {pipeline_mode = #tpu.pipeline_mode<synchronous>, transform_indices = @transform_1, window_bounds = array<i64: 3, 8, 24>}, {pipeline_mode = #tpu.pipeline_mode<synchronous>, transform_indices = @transform_2, window_bounds = array<i64: 3, 8, 24>}, {transform_indices = @transform_3, window_bounds = array<i64: 1, 8, 256>}]} {
    %0 = tpu.iota {dimensions = array<i32: 1>} : vector<8x256xi32>
    %c16_i32 = arith.constant 16 : i32
    %c0_i32 = arith.constant 0 : i32
    %1 = arith.cmpi eq, %c16_i32, %c0_i32 : i32
    %c1_i32 = arith.constant 1 : i32
    %2 = arith.select %1, %c1_i32, %c16_i32 : i32
    %3 = vector.broadcast %2 : i32 to vector<8x256xi32>
    %4 = arith.remsi %0, %3 : vector<8x256xi32>
    %c0_i32_0 = arith.constant 0 : i32
    %5 = vector.broadcast %c0_i32_0 : i32 to vector<8x256xi32>
    %6 = arith.cmpi ne, %4, %5 : vector<8x256xi32>
    %c0_i32_1 = arith.constant 0 : i32
    %7 = vector.broadcast %c0_i32_1 : i32 to vector<8x256xi32>
    %8 = arith.cmpi slt, %4, %7 : vector<8x256xi32>
    %c0_i32_2 = arith.constant 0 : i32
    %9 = arith.cmpi slt, %2, %c0_i32_2 : i32
    %10 = vector.broadcast %9 : i1 to vector<8x256xi1>
    %11 = vector.broadcast %10 : vector<8x256xi1> to vector<8x256xi1>
    %12 = arith.xori %8, %11 : vector<8x256xi1>
    %13 = arith.andi %12, %6 : vector<8x256xi1>
    %14 = vector.broadcast %2 : i32 to vector<8x256xi32>
    %15 = arith.addi %4, %14 : vector<8x256xi32>
    %16 = arith.select %13, %15, %4 : vector<8x256xi1>, vector<8x256xi32>
    %c0_i32_3 = arith.constant 0 : i32
    %17 = vector.broadcast %c0_i32_3 : i32 to vector<8x256xi32>
    %18 = arith.cmpi eq, %16, %17 : vector<8x256xi32>
    %c15_i32 = arith.constant 15 : i32
    %19 = vector.broadcast %c15_i32 : i32 to vector<8x256xi32>
    %20 = arith.cmpi eq, %16, %19 : vector<8x256xi32>
    %cst = arith.constant 0.000000e+00 : f32
    %21 = vector.broadcast %cst : f32 to vector<24x32xf32>
    %c0 = arith.constant 0 : index
    %c112 = arith.constant 112 : index
    %22 = vector.load %arg5[%c0, %c112] : memref<24x512xf32, #tpu.memory_space<vmem>>, vector<24x32xf32>
    tpu.vector_store %arg5[%c0, %c112], %21 {strides = array<i32>} : memref<24x512xf32, #tpu.memory_space<vmem>>, vector<24x32xf32>,
    %c0_4 = arith.constant 0 : index
    %c368 = arith.constant 368 : index
    %23 = vector.load %arg5[%c0_4, %c368] : memref<24x512xf32, #tpu.memory_space<vmem>>, vector<24x32xf32>
    tpu.vector_store %arg5[%c0_4, %c368], %21 {strides = array<i32>} : memref<24x512xf32, #tpu.memory_space<vmem>>, vector<24x32xf32>,
    %c0_5 = arith.constant 0 : index
    %c0_6 = arith.constant 0 : index
    %c0_7 = arith.constant 0 : index
    %24 = vector.load %arg1[%c0_5, %c0_6, %c0_7] : memref<1x8x256xf32, #tpu.memory_space<vmem>>, vector<1x8x256xf32>
    %25 = vector.shape_cast %24 : vector<1x8x256xf32> to vector<8x256xf32>
    %c0_8 = arith.constant 0 : index
    %c144 = arith.constant 144 : index
    %26 = vector.load %arg5[%c0_8, %c144] : memref<24x512xf32, #tpu.memory_space<vmem>>, vector<8x256xf32>
    tpu.vector_store %arg5[%c0_8, %c144], %25 {strides = array<i32>} : memref<24x512xf32, #tpu.memory_space<vmem>>, vector<8x256xf32>,
    %c8 = arith.constant 8 : index
    %c128 = arith.constant 128 : index
    %27 = vector.load %arg5[%c8, %c128] : memref<24x512xf32, #tpu.memory_space<vmem>>, vector<8x256xf32>
    tpu.vector_store %arg5[%c8, %c128], %25 {strides = array<i32>} : memref<24x512xf32, #tpu.memory_space<vmem>>, vector<8x256xf32>,
    %c16 = arith.constant 16 : index
    %c112_9 = arith.constant 112 : index
    %28 = vector.load %arg5[%c16, %c112_9] : memref<24x512xf32, #tpu.memory_space<vmem>>, vector<8x256xf32>
    tpu.vector_store %arg5[%c16, %c112_9], %25 {strides = array<i32>} : memref<24x512xf32, #tpu.memory_space<vmem>>, vector<8x256xf32>,
    %c0_10 = arith.constant 0 : index
    %c0_11 = arith.constant 0 : index
    %c0_12 = arith.constant 0 : index
    %29 = vector.load %arg2[%c0_10, %c0_11, %c0_12] : memref<3x8x24xf32, #tpu.memory_space<vmem>>, vector<1x8x24xf32>
    %30 = vector.shape_cast %29 : vector<1x8x24xf32> to vector<8x24xf32>
    %c0_13 = arith.constant 0 : index
    %c127 = arith.constant 127 : index
    %31 = vector.load %arg5[%c0_13, %c127] : memref<24x512xf32, #tpu.memory_space<vmem>>, vector<24x256xf32>
    %cst_14 = arith.constant dense<0.000000e+00> : vector<8x256xf32>
    %32 = tpu.matmul %30, %31, %cst_14 {dimension_numbers = #tpu.dot_dimension_numbers<[1], [0], [0], [1], [0, 0, 1, 1], [], []>} : vector<8x24xf32>, vector<24x256xf32>, vector<8x256xf32> -> vector<8x256xf32>
    %c1 = arith.constant 1 : index
    %c0_15 = arith.constant 0 : index
    %c0_16 = arith.constant 0 : index
    %33 = vector.load %arg2[%c1, %c0_15, %c0_16] : memref<3x8x24xf32, #tpu.memory_space<vmem>>, vector<1x8x24xf32>
    %34 = vector.shape_cast %33 : vector<1x8x24xf32> to vector<8x24xf32>
    %c0_17 = arith.constant 0 : index
    %c128_18 = arith.constant 128 : index
    %35 = vector.load %arg5[%c0_17, %c128_18] : memref<24x512xf32, #tpu.memory_space<vmem>>, vector<24x256xf32>
    %cst_19 = arith.constant dense<0.000000e+00> : vector<8x256xf32>
    %36 = tpu.matmul %34, %35, %cst_19 {dimension_numbers = #tpu.dot_dimension_numbers<[1], [0], [0], [1], [0, 0, 1, 1], [], []>} : vector<8x24xf32>, vector<24x256xf32>, vector<8x256xf32> -> vector<8x256xf32>
    %c2 = arith.constant 2 : index
    %c0_20 = arith.constant 0 : index
    %c0_21 = arith.constant 0 : index
    %37 = vector.load %arg2[%c2, %c0_20, %c0_21] : memref<3x8x24xf32, #tpu.memory_space<vmem>>, vector<1x8x24xf32>
    %38 = vector.shape_cast %37 : vector<1x8x24xf32> to vector<8x24xf32>
    %c0_22 = arith.constant 0 : index
    %c129 = arith.constant 129 : index
    %39 = vector.load %arg5[%c0_22, %c129] : memref<24x512xf32, #tpu.memory_space<vmem>>, vector<24x256xf32>
    %cst_23 = arith.constant dense<0.000000e+00> : vector<8x256xf32>
    %40 = tpu.matmul %38, %39, %cst_23 {dimension_numbers = #tpu.dot_dimension_numbers<[1], [0], [0], [1], [0, 0, 1, 1], [], []>} : vector<8x24xf32>, vector<24x256xf32>, vector<8x256xf32> -> vector<8x256xf32>
    %cst_24 = arith.constant 0.000000e+00 : f32
    %41 = vector.broadcast %cst_24 : f32 to vector<8x256xf32>
    %42 = arith.select %18, %41, %32 : vector<8x256xi1>, vector<8x256xf32>
    %43 = arith.addf %36, %42 : vector<8x256xf32>
    %cst_25 = arith.constant 0.000000e+00 : f32
    %44 = vector.broadcast %cst_25 : f32 to vector<8x256xf32>
    %45 = arith.select %20, %44, %40 : vector<8x256xi1>, vector<8x256xf32>
    %46 = arith.addf %43, %45 : vector<8x256xf32>
    %cst_26 = arith.constant dense<0.000000e+00> : vector<8xf32>
    %47 = vector.multi_reduction <add>, %46, %cst_26 [1] : vector<8x256xf32> to vector<8xf32>
    %48 = vector.shape_cast %47 : vector<8xf32> to vector<8x1xf32>
    %49 = arith.mulf %46, %46 : vector<8x256xf32>
    %cst_27 = arith.constant dense<0.000000e+00> : vector<8xf32>
    %50 = vector.multi_reduction <add>, %49, %cst_27 [1] : vector<8x256xf32> to vector<8xf32>
    %51 = vector.shape_cast %50 : vector<8xf32> to vector<8x1xf32>
    %cst_28 = arith.constant 3.906250e-03 : f32
    %52 = vector.broadcast %cst_28 : f32 to vector<8x1xf32>
    %53 = arith.mulf %48, %52 : vector<8x1xf32>
    %cst_29 = arith.constant 3.906250e-03 : f32
    %54 = vector.broadcast %cst_29 : f32 to vector<8x1xf32>
    %55 = arith.mulf %51, %54 : vector<8x1xf32>
    %56 = arith.mulf %53, %53 : vector<8x1xf32>
    %57 = arith.subf %55, %56 : vector<8x1xf32>
    %58 = vector.broadcast %53 : vector<8x1xf32> to vector<8x256xf32>
    %59 = arith.subf %46, %58 : vector<8x256xf32>
    %cst_30 = arith.constant 9.99999974E-6 : f32
    %60 = vector.broadcast %cst_30 : f32 to vector<8x1xf32>
    %61 = arith.addf %57, %60 : vector<8x1xf32>
    %62 = math.rsqrt %61 : vector<8x1xf32>
    %63 = vector.broadcast %62 : vector<8x1xf32> to vector<8x256xf32>
    %64 = arith.mulf %59, %63 : vector<8x256xf32>
    %cst_31 = arith.constant 0.000000e+00 : f32
    %65 = vector.broadcast %cst_31 : f32 to vector<8x256xf32>
    %66 = arith.maximumf %64, %65 : vector<8x256xf32>
    %c0_32 = arith.constant 0 : index
    %c144_33 = arith.constant 144 : index
    %67 = vector.load %arg5[%c0_32, %c144_33] : memref<24x512xf32, #tpu.memory_space<vmem>>, vector<8x256xf32>
    tpu.vector_store %arg5[%c0_32, %c144_33], %66 {strides = array<i32>} : memref<24x512xf32, #tpu.memory_space<vmem>>, vector<8x256xf32>,
    %c8_34 = arith.constant 8 : index
    %c128_35 = arith.constant 128 : index
    %68 = vector.load %arg5[%c8_34, %c128_35] : memref<24x512xf32, #tpu.memory_space<vmem>>, vector<8x256xf32>
    tpu.vector_store %arg5[%c8_34, %c128_35], %66 {strides = array<i32>} : memref<24x512xf32, #tpu.memory_space<vmem>>, vector<8x256xf32>,
    %c16_36 = arith.constant 16 : index
    %c112_37 = arith.constant 112 : index
    %69 = vector.load %arg5[%c16_36, %c112_37] : memref<24x512xf32, #tpu.memory_space<vmem>>, vector<8x256xf32>
    tpu.vector_store %arg5[%c16_36, %c112_37], %66 {strides = array<i32>} : memref<24x512xf32, #tpu.memory_space<vmem>>, vector<8x256xf32>,
    %c0_38 = arith.constant 0 : index
    %c0_39 = arith.constant 0 : index
    %c0_40 = arith.constant 0 : index
    %70 = vector.load %arg3[%c0_38, %c0_39, %c0_40] : memref<3x8x24xf32, #tpu.memory_space<vmem>>, vector<1x8x24xf32>
    %71 = vector.shape_cast %70 : vector<1x8x24xf32> to vector<8x24xf32>
    %c0_41 = arith.constant 0 : index
    %c127_42 = arith.constant 127 : index
    %72 = vector.load %arg5[%c0_41, %c127_42] : memref<24x512xf32, #tpu.memory_space<vmem>>, vector<24x256xf32>
    %cst_43 = arith.constant dense<0.000000e+00> : vector<8x256xf32>
    %73 = tpu.matmul %71, %72, %cst_43 {dimension_numbers = #tpu.dot_dimension_numbers<[1], [0], [0], [1], [0, 0, 1, 1], [], []>} : vector<8x24xf32>, vector<24x256xf32>, vector<8x256xf32> -> vector<8x256xf32>
    %c1_44 = arith.constant 1 : index
    %c0_45 = arith.constant 0 : index
    %c0_46 = arith.constant 0 : index
    %74 = vector.load %arg3[%c1_44, %c0_45, %c0_46] : memref<3x8x24xf32, #tpu.memory_space<vmem>>, vector<1x8x24xf32>
    %75 = vector.shape_cast %74 : vector<1x8x24xf32> to vector<8x24xf32>
    %c0_47 = arith.constant 0 : index
    %c128_48 = arith.constant 128 : index
    %76 = vector.load %arg5[%c0_47, %c128_48] : memref<24x512xf32, #tpu.memory_space<vmem>>, vector<24x256xf32>
    %cst_49 = arith.constant dense<0.000000e+00> : vector<8x256xf32>
    %77 = tpu.matmul %75, %76, %cst_49 {dimension_numbers = #tpu.dot_dimension_numbers<[1], [0], [0], [1], [0, 0, 1, 1], [], []>} : vector<8x24xf32>, vector<24x256xf32>, vector<8x256xf32> -> vector<8x256xf32>
    %c2_50 = arith.constant 2 : index
    %c0_51 = arith.constant 0 : index
    %c0_52 = arith.constant 0 : index
    %78 = vector.load %arg3[%c2_50, %c0_51, %c0_52] : memref<3x8x24xf32, #tpu.memory_space<vmem>>, vector<1x8x24xf32>
    %79 = vector.shape_cast %78 : vector<1x8x24xf32> to vector<8x24xf32>
    %c0_53 = arith.constant 0 : index
    %c129_54 = arith.constant 129 : index
    %80 = vector.load %arg5[%c0_53, %c129_54] : memref<24x512xf32, #tpu.memory_space<vmem>>, vector<24x256xf32>
    %cst_55 = arith.constant dense<0.000000e+00> : vector<8x256xf32>
    %81 = tpu.matmul %79, %80, %cst_55 {dimension_numbers = #tpu.dot_dimension_numbers<[1], [0], [0], [1], [0, 0, 1, 1], [], []>} : vector<8x24xf32>, vector<24x256xf32>, vector<8x256xf32> -> vector<8x256xf32>
    %cst_56 = arith.constant 0.000000e+00 : f32
    %82 = vector.broadcast %cst_56 : f32 to vector<8x256xf32>
    %83 = arith.select %18, %82, %73 : vector<8x256xi1>, vector<8x256xf32>
    %84 = arith.addf %77, %83 : vector<8x256xf32>
    %cst_57 = arith.constant 0.000000e+00 : f32
    %85 = vector.broadcast %cst_57 : f32 to vector<8x256xf32>
    %86 = arith.select %20, %85, %81 : vector<8x256xi1>, vector<8x256xf32>
    %87 = arith.addf %84, %86 : vector<8x256xf32>
    %cst_58 = arith.constant dense<0.000000e+00> : vector<8xf32>
    %88 = vector.multi_reduction <add>, %87, %cst_58 [1] : vector<8x256xf32> to vector<8xf32>
    %89 = vector.shape_cast %88 : vector<8xf32> to vector<8x1xf32>
    %90 = arith.mulf %87, %87 : vector<8x256xf32>
    %cst_59 = arith.constant dense<0.000000e+00> : vector<8xf32>
    %91 = vector.multi_reduction <add>, %90, %cst_59 [1] : vector<8x256xf32> to vector<8xf32>
    %92 = vector.shape_cast %91 : vector<8xf32> to vector<8x1xf32>
    %cst_60 = arith.constant 3.906250e-03 : f32
    %93 = vector.broadcast %cst_60 : f32 to vector<8x1xf32>
    %94 = arith.mulf %89, %93 : vector<8x1xf32>
    %cst_61 = arith.constant 3.906250e-03 : f32
    %95 = vector.broadcast %cst_61 : f32 to vector<8x1xf32>
    %96 = arith.mulf %92, %95 : vector<8x1xf32>
    %97 = arith.mulf %94, %94 : vector<8x1xf32>
    %98 = arith.subf %96, %97 : vector<8x1xf32>
    %99 = vector.broadcast %94 : vector<8x1xf32> to vector<8x256xf32>
    %100 = arith.subf %87, %99 : vector<8x256xf32>
    %cst_62 = arith.constant 9.99999974E-6 : f32
    %101 = vector.broadcast %cst_62 : f32 to vector<8x1xf32>
    %102 = arith.addf %98, %101 : vector<8x1xf32>
    %103 = math.rsqrt %102 : vector<8x1xf32>
    %104 = vector.broadcast %103 : vector<8x1xf32> to vector<8x256xf32>
    %105 = arith.mulf %100, %104 : vector<8x256xf32>
    %106 = arith.addf %105, %25 : vector<8x256xf32>
    %cst_63 = arith.constant 0.000000e+00 : f32
    %107 = vector.broadcast %cst_63 : f32 to vector<8x256xf32>
    %108 = arith.maximumf %106, %107 : vector<8x256xf32>
    %c0_64 = arith.constant 0 : index
    %c0_65 = arith.constant 0 : index
    %c0_66 = arith.constant 0 : index
    %109 = vector.load %arg4[%c0_64, %c0_65, %c0_66] : memref<1x8x256xf32, #tpu.memory_space<vmem>>, vector<1x8x256xf32>
    %110 = vector.shape_cast %109 : vector<1x8x256xf32> to vector<8x256xf32>
    %111 = vector.shape_cast %108 : vector<8x256xf32> to vector<1x8x256xf32>
    tpu.vector_store %arg4[%c0_64, %c0_65, %c0_66], %111 {strides = array<i32>} : memref<1x8x256xf32, #tpu.memory_space<vmem>>, vector<1x8x256xf32>,
    return
  }
  func.func @transform_0(%arg0: i32) -> (i32, i32, i32) {
    %c0_i32 = arith.constant 0 : i32
    %c0_i32_0 = arith.constant 0 : i32
    %c0_i32_1 = arith.constant 0 : i32
    return %arg0, %c0_i32, %c0_i32_0 : i32, i32, i32
  }
  func.func @transform_1(%arg0: i32) -> (i32, i32, i32) {
    %c0_i32 = arith.constant 0 : i32
    %c0_i32_0 = arith.constant 0 : i32
    %c0_i32_1 = arith.constant 0 : i32
    %c0_i32_2 = arith.constant 0 : i32
    return %c0_i32, %c0_i32_0, %c0_i32_1 : i32, i32, i32
  }
  func.func @transform_2(%arg0: i32) -> (i32, i32, i32) {
    %c0_i32 = arith.constant 0 : i32
    %c0_i32_0 = arith.constant 0 : i32
    %c0_i32_1 = arith.constant 0 : i32
    %c0_i32_2 = arith.constant 0 : i32
    return %c0_i32, %c0_i32_0, %c0_i32_1 : i32, i32, i32
  }
  func.func @transform_3(%arg0: i32) -> (i32, i32, i32) {
    %c0_i32 = arith.constant 0 : i32
    %c0_i32_0 = arith.constant 0 : i32
    %c0_i32_1 = arith.constant 0 : i32
    return %arg0, %c0_i32, %c0_i32_0 : i32, i32, i32
  }
}

</mosaic_0001>

<bundles_post_ra>
// kernel: tpu_custom_call.1
= control target key start
LH: loop header
LB: loop body
LE: loop exit
PB: predicated region body
PF: predicated region fallthrough
CT: control target
= control target key end

     0   :  { %8 = vsyncpa [#allocation4], 0  ;;  %s1668_s0 = inlined_call_operand.hbm [shape: f32[2,8,256], index: 0, kind: input, shape index: {}]   ;;  %s1669_s1 = inlined_call_operand.hbm [shape: f32[3,8,24], index: 1, kind: input, shape index: {}]   ;;  %s1670_s2 = inlined_call_operand.hbm [shape: f32[3,8,24], index: 2, kind: input, shape index: {}]   ;;  %s1671_s3 = inlined_call_operand.hbm [shape: f32[2,8,256], index: 3, kind: output, shape index: {}]  }
   0x1   :  { %10 = vsyncpa [#allocation4 + $0x1], 0 }
   0x2   :  { %11 = vsyncpa [#allocation7], 0 }
   0x3   :  { %12 = vsyncpa [#allocation5], 0 }
   0x4   :  { %14 = vsyncpa [#allocation5 + $0x1], 0  ;;  %s1347_s12 = smov 0   ;;  %s1349_s13 = smov 0  }
   0x5   :  { %s1351_s14 = smov 0   ;;  %s1353_s15 = smov 0  }
   0x6 LB: > { %s130_s18 = sshll.u32 %s1669_s1, 4  ;;  %s1371_s19 = sadd.s32 4294967295, %s1316_s15   ;;  %s1316_s15 = sphi %s1353_s15, %s1690_s15   ;;  %s1312_s14 = sphi %s1351_s14, %s1689_s14   ;;  %s1308_s13 = sphi %s1349_s13, %s1688_s13   ;;  %s1304_s12 = sphi %s1347_s12, %s1687_s12   ;;  %s131_s18 = int_to_ptr.hbm [resolvable:$true] %s130_s18 }
   0x7   : > { %p967_p0 = scmp.ge.s32.totalorder %s1316_s15, 1  ;;  %p41_p1 = scmp.eq.s32.totalorder %s1371_s19, 0 }
   0x8   : > { %p119_p2 = scmp.lt.s32.totalorder %s1316_s15, 3  ;;  %s1318_s21 = smov [#allocation6]  }
   0x9   : > { %s132_s22 = sshll.u32 %s1318_s21, 4  ;;  %s144_s25 = sshll.u32 %s1670_s2, 4  ;;  %s133_s22 = int_to_ptr.vmem [resolvable:$true] %s132_s22  ;;  %s145_s25 = int_to_ptr.hbm [resolvable:$true] %s144_s25 }
   0xa   : > { %p1376_p3 = pnand %p967_p0, %p119_p2  ;;  %s1319_s26 = smov [#allocation8]  }
   0xb   : > { %s146_s27 = sshll.u32 %s1319_s26, 4  ;;  %s1320_s28 = smov 128   ;;  %s147_s27 = int_to_ptr.vmem [resolvable:$true] %s146_s27 }
   0xc   : > { %p1010_p4 = pneg %p1376_p3  ;;  %s1321_s29 = smov 8  }
   0xd   : > { %s966_s30 = sadd.s32 4294967294, %s1316_s15   ;;  %s1390_s4 = sadd.s32 1, %s1316_s15  }
   0xe   : > { %p1011_p6 = pnand %p1010_p4, %p41_p1  ;;  %s24_s5 = ssub.s32 %s1316_s15, %s1390_s4 }
   0xf   : > { %s27_s6 = sadd.s32 1, %s1312_s14  ;;  %p25_p7 = scmp.eq.s32.totalorder %s24_s5, 0 }
  0x10   : > { %1013 = dma.hbm_to_vmem [thread:$0]  (!%p1011_p6), %s131_s18, 384, %s133_s22, [#allocation7], %s1320_s28, %s1320_s28, %s1321_s29  }
  0x11   : > { %1016 = dma.hbm_to_vmem [thread:$0]  (!%p1011_p6), %s145_s25, 384, %s147_s27, [#allocation7], %s1320_s28, %s1320_s28, %s1321_s29  }
  0x12   : > { %p34_p8 = scmp.ne.s32.totalorder %s1312_s14, %s1308_s13  ;;  %p35_p9 = scmp.eq.s32.totalorder %s1316_s15, 0 }
  0x13   : > { %p40_p10 = scmp.ne.s32.totalorder %s1308_s13, %s1304_s12  ;;  %p106_p13 = scmp.eq.s32.totalorder %s1371_s19, 1 }
  0x14   : > { %s1401_s7 = scalar_select %p25_p7, %s1312_s14, %s27_s6  }
  0x15   : > { %p1403_p11 = por %p35_p9, %p34_p8  ;;  %p1409_p12 = por %p41_p1, %p40_p10 }
  0x16   : > { %p112_p0 = scmp.eq.s32.totalorder %s966_s30, 1  ;;  %p1027_p2 = scmp.lt.s32.totalorder %s1316_s15, 2 }
  0x17   : > { %s160_s10 = sand.u32 1, %s1312_s14   ;;  %p1416_p4 = por %p106_p13, %p34_p8 }
  0x18   : > { %p1420_p6 = por %p112_p0, %p40_p10  ;;  %s971_s17 = sshll.u32 %s160_s10, 4 }
  0x19   : > { %s996_s18 = sshll.u32 %s1316_s15, 4  ;;  %s164_s24 = scalar_lea.vmem [#allocation3], %s971_s17 }
  0x1a   : > { %s169_s23 = scalar_lea.hbm %s1668_s0, %s996_s18  ;;  %s173_s25 = sshll.u32 %s164_s24, 4  ;;  %s174_s25 = int_to_ptr.vmem [resolvable:$true] %s173_s25 }
  0x1b   : > { %s171_s26 = sshll.u32 %s169_s23, 4  ;;  %p1430_p7 = pnand %p1027_p2, %p1403_p11  ;;  %s172_s26 = int_to_ptr.hbm [resolvable:$true] %s171_s26 }
  0x1c   : > { %s161_s28 = scalar_lea.sflag [#allocation4], %s160_s10  ;;  %s1216_s29 = sshra.s32 %s172_s26, 4  ;;  %s1217_s29 = int_to_ptr.hbm [resolvable:$true] %s1216_s29 }
  0x1d   : > { %s1218_s30 = scalar_lea.hbm %s1217_s29, 16  ;;  %p1220_p9 = pneg %p1430_p7 }
  0x1e   : > { %p1219_p8 = scmp.ne.s32.totalorder %s1217_s29, %s1218_s30  ;;  %s1223_s17 = scalar_lea.hbm %s1668_s0, 32 }
  0x1f   : > { %p1224_p11 = scmp.lt.s32.totalorder %s1217_s29, %s1668_s0  ;;  %p1225_p0 = scmp.lt.s32.totalorder %s1223_s17, %s1218_s30 }
  0x20   : > { %p1221_p10 = pnand %p1220_p9, %p1219_p8 }
  0x21   : > { %p1226_p2 = por %p1225_p0, %p1224_p11 }
  0x22   : > { %p1222_p13 = pneg %p1221_p10 }
  0x24   : > { %p1227_p5 = pnand %p1226_p2, %p1222_p13 }
  0x26   : > { %1230 = shalt.err (!%p1227_p5)
}
  0x27   : > { %1020 = dma.hbm_to_vmem [thread:$0]  (!%p1430_p7), %s172_s26, 256, %s174_s25, %s161_s28  }
  0x28   : > { %182 = sbr.rel (%p1376_p3) target bundleno = 1158 (0x486), region = 32  ;;  %s1447_s10 = sand.u32 (!%p1376_p3), 1, %s1308_s13  }
  0x29   : > { %s975_s21 = sshll.u32 (!%p1376_p3), %s1447_s10, 4  ;;  %s185_s22 = scalar_lea.sflag (!%p1376_p3), [#allocation4], %s1447_s10 }
  0x2a   : > { %s188_s23 = scalar_lea.vmem (!%p1376_p3), [#allocation3], %s975_s21 }
  0x2d   : > { %1291 = dma.done.wait (%p1409_p12), %s185_s22, 256  }
  0x2e   : > { %1293 = vsyncadd (%p1409_p12), %s185_s22, 4294967040 }
  0x2f   : > { %1295 = dma.done.wait (%p41_p1), [#allocation7], 768  }
  0x30   : > { %1297 = vsyncadd (%p41_p1), [#allocation7], 4294966528  ;;  %vm255_vm0 = vcmask 130048   ;;  %v1322_v0 = vmov 0.0   ;;  %vm253_vm1 = vcmask 1048448   ;;  %v1465_v1 = vld [vmem:[%s188_s23] sm:$0xff] }
  0x31   : > { %256 = vst.msk [vmem:[#allocation2 + $0x8] sm:$0xff] %vm255_vm0, %v1322_v0  ;;  %s1323_s20 = smov 16   ;;  %s1324_s9 = smov 112   ;;  %v1475_v2 = vld [vmem:[%s188_s23 + $0x8] sm:$0xff]  ;;  %vm279_vm2 = vcmask 1047680   ;;  %vm289_vm3 = vcmask 916480  }
  0x32   : > { %262 = vst.msk [vmem:[#allocation2 + $0x18] sm:$0xff] %vm255_vm0, %v1322_v0  ;;  %271 = vrot.lane.b32.xlu1 %v1465_v1, %s1323_s20  ;;  %285 = vrot.lane.b32.xlu0 %v1465_v1, %s1324_s9  ;;  %v1072_v3 = vpack.i.bf16 %v1475_v2, %v1465_v1  ;;  %s1325_s24 = smov 1   ;;  %s1326_s25 = smov 127   ;;  %vm334_vm4 = vcmask 7168   ;;  %v297_v43 = vld [vmem:[#allocation6] sm:$0xff]  ;;  %vm347_vm5 = vcmask 195584  }
  0x33   : > { %264 = vst.msk [vmem:[#allocation2 + $0x38] sm:$0xff] %vm255_vm0, %v1322_v0  ;;  %vm431_vm6 = vcmask 1039360   ;;  %v392_v58 = vld [vmem:[#allocation6 + $0x8] sm:$0xff]  ;;  %v394_v60 = vld [vmem:[#allocation6 + $0x10] sm:$0xff]  ;;  %s997_s26 = sshll.u32 %s1371_s19, 4  ;;  %s221_s19 = scalar_lea.vmem [#allocation9], %s975_s21 }
  0x34   : > { %266 = vst.msk [vmem:[#allocation2 + $0x58] sm:$0xff] %vm255_vm0, %v1322_v0  ;;  %s872_s29 = scalar_lea.hbm %s1671_s3, %s997_s26  ;;  %s874_s30 = sshll.u32 %s221_s19, 4  ;;  %s875_s30 = int_to_ptr.vmem [resolvable:$true] %s874_s30 }
  0x35   : > { %254 = vst.msk [vmem:[#allocation2] sm:$0xff] %vm253_vm1, %v1322_v0  ;;  %s876_s5 = sshll.u32 %s872_s29, 4  ;;  %s861_s6 = scalar_lea.sflag [#allocation5], %s1447_s10  ;;  %s877_s5 = int_to_ptr.hbm [resolvable:$true] %s876_s5 }
  0x36   : > { %257 = vst.msk [vmem:[#allocation2 + $0x20] sm:$0xff] %vm253_vm1, %v1322_v0  ;;  %s1260_s17 = sshra.s32 %s877_s5, 4  ;;  %s1266_s21 = scalar_lea.hbm %s1671_s3, 32  ;;  %s1261_s17 = int_to_ptr.hbm [resolvable:$true] %s1260_s17 }
  0x37   : > { %259 = vst.msk [vmem:[#allocation2 + $0x40] sm:$0xff] %vm253_vm1, %v1322_v0  ;;  %s1262_s18 = scalar_lea.hbm %s1261_s17, 16  ;;  %p1267_p12 = scmp.lt.s32.totalorder %s1261_s17, %s1671_s3 }
  0x38   : > { %265 = vst.msk [vmem:[#allocation2 + $0x50] sm:$0xff] %vm253_vm1, %v1322_v0  ;;  %p1263_p1 = scmp.ne.s32.totalorder %s1261_s17, %s1262_s18  ;;  %p1268_p7 = scmp.lt.s32.totalorder %s1266_s21, %s1262_s18 }
  0x3a   : > { %287 = vrot.lane.b32.xlu0 %v1475_v2, %s1324_s9  ;;  %273 = vrot.lane.b32.xlu1 %v1475_v2, %s1323_s20  ;;  %v1515_v22 = vld [vmem:[#allocation2 + $0x38] sm:$0xff]  ;;  %p1264_p3 = pnand %p1263_p1, %p1416_p4  ;;  %p1269_p8 = por %p1268_p7, %p1267_p12 }
  0x3b   : > { %v1484_v4 = vld [vmem:[#allocation2 + $0x58] sm:$0xff]  ;;  %v1097_v23 = vpack.i.bf16 %v1515_v22, %v1475_v2 }
  0x3c   : > { %v1077_v5 = vpack.i.bf16 %v1465_v1, %v1484_v4  ;;  %v1491_v8 = vld [vmem:[#allocation2] sm:$0xff]  ;;  %p1265_p5 = pneg %p1264_p3 }
  0x3d   : > { %v1500_v14 = vld [vmem:[#allocation2 + $0x20] sm:$0xff] }
  0x3e   : > { %1078 = vrot.lane.b32.xlu2 %v1077_v5, %s1326_s25  ;;  %v222_v5 = vlaneseq  ;;  %p1270_p9 = pnand %p1269_p8, %p1265_p5 }
  0x42   : > { %1073 = vrot.lane.b32.xlu0 %v1072_v3, %s1325_s24 }
  0x98   : > { %v1079_v25 = vpop.permute.xlu2 %1078 }
  0x99   : > { %v1080_v48 = vunpack.i.l.bf16 %v1079_v25  ;;  %v1081_v52 = vunpack.i.h.bf16 %v1079_v25 }
  0xa4   : > { %v272_v6 = vpop.permute.xlu1 %271  ;;  %v286_v7 = vpop.permute.xlu0 %285 }
  0xa5   : > { %280 = vst.msk [vmem:[#allocation2 + $0x8] sm:$0xff] %vm279_vm2, %v272_v6 }
  0xa6   : > { %294 = vst.msk [vmem:[#allocation2 + $0x40] sm:$0xff] %vm253_vm1, %v286_v7 }
  0xac   : > { %v288_v9 = vpop.permute.xlu0 %287  ;;  %v299_v10 = vld [vmem:[#allocation2 + $0x8] sm:$0xff]  ;;  %v274_v11 = vpop.permute.xlu1 %273 }
  0xad   : > { %296 = vst.msk [vmem:[#allocation2 + $0x50] sm:$0xff] %vm289_vm3, %v288_v9  ;;  %v1087_v12 = vpack.i.bf16 %v299_v10, %v1491_v8  ;;  %v1498_v13 = vsel %vm255_vm0, %v272_v6, %v274_v11  ;;  %v290_v15 = vsel %vm289_vm3, %v286_v7, %v288_v9  ;;  %v304_v20 = vld [vmem:[#allocation2 + $0x40] sm:$0xff]  ;;  %v223_v7 = vand.u32 127, %v222_v5 }
  0xae   : > { %282 = vst.msk [vmem:[#allocation2 + $0x18] sm:$0xff] %vm255_vm0, %v274_v11  ;;  %v1107_v17 = vpack.i.bf16 %v1498_v13, %v299_v10  ;;  %v1092_v21 = vpack.i.bf16 %v290_v15, %v304_v20 }
  0xaf   : > { %1088 = vrot.lane.b32.xlu0 %v1087_v12, %s1325_s24  ;;  %v229_v9 = vand.u32 15, %v223_v7  ;;  %v224_v11 = vadd.s32 128, %v223_v7 }
  0xb1   : > { %vm1543_vm7 = vcmp.eq.s32.totalorder %v229_v9, 0  ;;  %vm1549_vm8 = vcmp.eq.s32.totalorder %v229_v9, 15 }
  0xb4   : > { %v1503_v16 = vld [vmem:[#allocation2 + $0x50] sm:$0xff]  ;;  %v1074_v27 = vpop.permute.xlu0 %1073 }
  0xb5   : > { %v1082_v18 = vpack.i.bf16 %v1500_v14, %v1503_v16  ;;  %v1102_v19 = vpack.i.bf16 %v1503_v16, %v290_v15  ;;  %v397_v24 = vld [vmem:[#allocation2 + $0x18] sm:$0xff]  ;;  %v1076_v28 = vunpack.i.h.bf16 %v1074_v27  ;;  %v1075_v29 = vunpack.i.l.bf16 %v1074_v27 }
  0xb7   : > { %1083 = vrot.lane.b32.xlu2 %v1082_v18, %s1325_s24  ;;  %1103 = vrot.lane.b32.xlu1 %v1102_v19, %s1326_s25  ;;  %v338_v37 = vsel %vm334_vm4, %v1075_v29, %v1076_v28 }
  0xb8   : > { %1108 = vrot.lane.b32.xlu0 %v1107_v17, %s1326_s25 }
  0xbf   : > { %1093 = vrot.lane.b32.xlu2 %v1092_v21, %s1325_s24  ;;  %320 = vrot.lane.b32.xlu1 %v1498_v13, %s1325_s24 }
  0xc7   : > { %1098 = vrot.lane.b32.xlu2 %v1097_v23, %s1326_s25  ;;  %417 = vrot.lane.b32.xlu1 %v397_v24, %s1326_s25 }
 0x111   : > { %v1084_v26 = vpop.permute.xlu2 %1083 }
 0x112   : > { %v1086_v31 = vunpack.i.h.bf16 %v1084_v26  ;;  %v1085_v32 = vunpack.i.l.bf16 %v1084_v26 }
 0x114   : > { %v337_v38 = vsel %vm334_vm4, %v1086_v31, %v1075_v29 }
 0x119   : > { %v1094_v30 = vpop.permute.xlu2 %1093 }
 0x11a   : > { %v1096_v33 = vunpack.i.h.bf16 %v1094_v30  ;;  %v1095_v34 = vunpack.i.l.bf16 %v1094_v30 }
 0x11c   : > { %v339_v35 = vsel %vm334_vm4, %v1095_v34, %v1096_v33  ;;  %v340_v36 = vsel %vm334_vm4, %v1096_v33, %v1085_v32 }
 0x11d   : > { %364 = vmatpush.msra.mxu0 %v339_v35  ;;  %384 = vmatpush.msra.mxu1 %v340_v36 }
 0x11f   : > { %365 = vmatpush.msra.mxu0 %v337_v38  ;;  %385 = vmatpush.msra.mxu1 %v338_v37 }
 0x121   : > { %v1089_v39 = vpop.permute.xlu0 %1088  ;;  %v1099_v44 = vpop.permute.xlu2 %1098 }
 0x122   : > { %v1091_v40 = vunpack.i.h.bf16 %v1089_v39  ;;  %v1090_v41 = vunpack.i.l.bf16 %v1089_v39  ;;  %v1101_v45 = vunpack.i.h.bf16 %v1099_v44  ;;  %v1100_v46 = vunpack.i.l.bf16 %v1099_v44 }
 0x124   : > { %v335_v42 = vsel %vm334_vm4, %v1090_v41, %v1091_v40  ;;  %v435_v53 = vsel %vm431_vm6, %v1100_v46, %v1101_v45  ;;  %v434_v59 = vsel %vm431_vm6, %v1081_v52, %v1100_v46 }
 0x125   : > { %366 = vmatpush.msra.mxu0 %v335_v42 }
 0x126   : > { %979 = vmatmul.msk.f32.vlgmr.msra.gmra.mxu0 %vm347_vm5, %v297_v43 }
 0x127   : > { %505 = vmatpush.msrb.mxu0 %v290_v15  ;;  %v236_v15 = vand.u32 15, %v224_v11 }
 0x129   : > { %506 = vmatpush.msrb.mxu0 %v1465_v1  ;;  %v1104_v47 = vpop.permute.xlu1 %1103  ;;  %vm1553_vm9 = vcmp.eq.s32.totalorder %v236_v15, 0  ;;  %vm1559_vm10 = vcmp.eq.s32.totalorder %v236_v15, 15 }
 0x12a   : > { %v1106_v49 = vunpack.i.h.bf16 %v1104_v47  ;;  %v1105_v50 = vunpack.i.l.bf16 %v1104_v47  ;;  %v1109_v51 = vpop.permute.xlu0 %1108 }
 0x12b   : > { %507 = vmatpush.msrb.mxu0 %v299_v10  ;;  %v1111_v54 = vunpack.i.h.bf16 %v1109_v51  ;;  %v1110_v55 = vunpack.i.l.bf16 %v1109_v51 }
 0x12c   : > { %v436_v56 = vsel %vm431_vm6, %v1105_v50, %v1106_v49  ;;  %v437_v57 = vsel %vm431_vm6, %v1106_v49, %v1080_v48 }
 0x12d   : > { %460 = vmatpush.msra.mxu2 %v436_v56  ;;  %480 = vmatpush.msra.mxu3 %v437_v57  ;;  %v432_v61 = vsel %vm431_vm6, %v1110_v55, %v1111_v54 }
 0x12e   : > { %983 = vmatmul.msk.f32.vlgmr.msrb.gmra.mxu0 %vm347_vm5, %v392_v58 }
 0x12f   : > { %461 = vmatpush.msra.mxu2 %v434_v59  ;;  %481 = vmatpush.msra.mxu3 %v435_v53 }
 0x131   : > { %v321_v62 = vpop.permute.xlu1 %320  ;;  %462 = vmatpush.msra.mxu2 %v432_v61 }
 0x132   : > { %v336_v63 = vsel %vm334_vm4, %v1091_v40, %v321_v62  ;;  %981 = vmatmul.msk.f32.vlgmr.msra.gmra.mxu2 %vm347_vm5, %v394_v60 }
 0x133   : > { %386 = vmatpush.msra.mxu1 %v336_v63 }
 0x134   : > { %980 = vmatmul.msk.f32.vlgmr.msra.gmra.mxu1 %vm347_vm5, %v297_v43 }
 0x135   : > { %525 = vmatpush.msrb.mxu1 %v1503_v16 }
 0x137   : > { %526 = vmatpush.msrb.mxu1 %v1475_v2 }
 0x139   : > { %527 = vmatpush.msrb.mxu1 %v1498_v13  ;;  %v418_v0 = vpop.permute.xlu1 %417 }
 0x13a   : > { %v433_v3 = vsel %vm431_vm6, %v1111_v54, %v418_v0 }
 0x13b   : > { %482 = vmatpush.msra.mxu3 %v433_v3 }
 0x13c   : > { %982 = vmatmul.msk.f32.vlgmr.msra.gmra.mxu3 %vm347_vm5, %v394_v60  ;;  %984 = vmatmul.msk.f32.vlgmr.msrb.gmra.mxu1 %vm347_vm5, %v392_v58 }
 0x1a3   : > { %v368_v6 = vpop.f32.mrf.mxu0 }
 0x1a4   : > { %v487_v13 = vsel %vm1543_vm7, 0.0, %v368_v6 }
 0x1ab   : > { %v509_v16 = vpop.f32.mrf.mxu0 }
 0x1ac   : > { %v510_v20 = vadd.f32 %v509_v16, %v487_v13 }
 0x1b1   : > { %v388_v10 = vpop.f32.mrf.mxu1 }
 0x1b2   : > { %v488_v25 = vsel %vm1553_vm9, 0.0, %v388_v10 }
 0x1b5   : > { %v464_v18 = vpop.f32.mrf.mxu2 }
 0x1b6   : > { %v532_v21 = vsel %vm1549_vm8, 0.0, %v464_v18 }
 0x1b7   : > { %v534_v26 = vadd.f32 %v532_v21, %v510_v20 }
 0x1b9   : > { %v529_v23 = vpop.f32.mrf.mxu1  ;;  %v539_v32 = vmul.f32 %v534_v26, %v534_v26 }
 0x1ba   : > { %v530_v27 = vadd.f32 %v529_v23, %v488_v25 }
 0x1bf   : > { %v484_v28 = vpop.f32.mrf.mxu3 }
 0x1c0   : > { %v533_v29 = vsel %vm1559_vm10, 0.0, %v484_v28 }
 0x1c1   : > { %v535_v30 = vadd.f32 %v533_v29, %v530_v27 }
 0x1c3   : > { %v536_v31 = vadd.f32 %v535_v30, %v534_v26  ;;  %v540_v33 = vmul.f32 %v535_v30, %v535_v30 }
 0x1c5   : > { %537 = vadd.xlane.f32.xlu2 %v536_v31  ;;  %v541_v34 = vadd.f32 %v540_v33, %v539_v32  ;;  %v591_v32 = vld [vmem:[#allocation8] sm:$0xff] }
 0x1c7   : > { %542 = vadd.xlane.f32.xlu0 %v541_v34 }
 0x238   : > { %v538_v35 = vpop.xlane.xlu2 %537 }
 0x239   : > { %v544_v36 = vmul.f32 0.00390625, %v538_v35 }
 0x23a   : > { %v543_v37 = vpop.xlane.xlu0 %542 }
 0x23b   : > { %v545_v38 = vmul.f32 0.00390625, %v543_v37  ;;  %v546_v39 = vmul.f32 %v544_v36, %v544_v36  ;;  %v548_v48 = vsub.f32 %v534_v26, %v544_v36  ;;  %v549_v49 = vsub.f32 %v535_v30, %v544_v36 }
 0x23d   : > { %v547_v40 = vsub.f32 %v545_v38, %v546_v39 }
 0x23f   : > { %v550_v41 = vadd.f32 1e-05, %v547_v40 }
 0x241   : > { %1152 = vrsqrt.f32 %v550_v41  ;;  %vm557_vm12 = vweird.f32 %v550_v41 }
 0x247   : > { %v1153_v42 = vpop.eup %1152 }
 0x248   : > { %v552_v43 = vmul.f32 %v1153_v42, %v550_v41  ;;  %vm558_vm11 = vweird.f32 %v1153_v42 }
 0x249   : > { %vm559_vm13 = vmor %vm557_vm12, %vm558_vm11 }
 0x24a   : > { %v553_v44 = vmul.f32 %v1153_v42, %v552_v43 }
 0x24c   : > { %v554_v45 = vmul.f32 0.5, %v553_v44  ;;  %v684_v44 = vld [vmem:[#allocation8 + $0x8] sm:$0xff] }
 0x24e   : > { %v555_v46 = vsub.f32 1.5, %v554_v45 }
 0x250   : > { %v556_v47 = vmul.f32 %v1153_v42, %v555_v46 }
 0x252   : > { %v560_v50 = vsel %vm559_vm13, %v1153_v42, %v556_v47 }
 0x253   : > { %v561_v51 = vmul.f32 %v560_v50, %v548_v48  ;;  %v562_v52 = vmul.f32 %v560_v50, %v549_v49 }
 0x255   : > { %v1567_v53 = vmax.f32 %v561_v51, 0.0  ;;  %v1569_v54 = vmax.f32 %v562_v52, 0.0 }
 0x257   : > { %580 = vrot.lane.b32.xlu1 %v1567_v53, %s1324_s9  ;;  %v1117_v55 = vpack.i.bf16 %v1569_v54, %v1567_v53  ;;  %v1127_v7 = vpack.i.bf16 %v1567_v53, %v1484_v4  ;;  %v1132_v9 = vpack.i.bf16 %v1515_v22, %v1569_v54 }
 0x25f   : > { %582 = vrot.lane.b32.xlu1 %v1569_v54, %s1324_s9 }
 0x267   : > { %567 = vrot.lane.b32.xlu1 %v1567_v53, %s1323_s20 }
 0x26f   : > { %569 = vrot.lane.b32.xlu1 %v1569_v54, %s1323_s20 }
 0x277   : > { %1118 = vrot.lane.b32.xlu1 %v1117_v55, %s1325_s24 }
 0x2c9   : > { %v581_v56 = vpop.permute.xlu1 %580 }
 0x2ca   : > { %588 = vst.msk [vmem:[#allocation2 + $0x40] sm:$0xff] %vm253_vm1, %v581_v56 }
 0x2d1   : > { %v583_v57 = vpop.permute.xlu1 %582  ;;  %v598_v58 = vld [vmem:[#allocation2 + $0x40] sm:$0xff] }
 0x2d2   : > { %v584_v59 = vsel %vm289_vm3, %v581_v56, %v583_v57  ;;  %590 = vst.msk [vmem:[#allocation2 + $0x50] sm:$0xff] %vm289_vm3, %v583_v57 }
 0x2d3   : > { %v1137_v60 = vpack.i.bf16 %v584_v59, %v598_v58 }
 0x2d5   : > { %1138 = vrot.lane.b32.xlu1 %v1137_v60, %s1325_s24 }
 0x2d9   : > { %v568_v61 = vpop.permute.xlu1 %567  ;;  %v600_v62 = vld [vmem:[#allocation2 + $0x50] sm:$0xff] }
 0x2da   : > { %575 = vst.msk [vmem:[#allocation2 + $0x8] sm:$0xff] %vm279_vm2, %v568_v61  ;;  %v1112_v63 = vpack.i.bf16 %v1500_v14, %v600_v62  ;;  %v1142_v14 = vpack.i.bf16 %v600_v62, %v584_v59 }
 0x2dc   : > { %1113 = vrot.lane.b32.xlu2 %v1112_v63, %s1325_s24 }
 0x2e1   : > { %v570_v0 = vpop.permute.xlu1 %569  ;;  %v593_v3 = vld [vmem:[#allocation2 + $0x8] sm:$0xff] }
 0x2e2   : > { %v571_v5 = vsel %vm255_vm0, %v568_v61, %v570_v0  ;;  %577 = vst.msk [vmem:[#allocation2 + $0x18] sm:$0xff] %vm255_vm0, %v570_v0  ;;  %v1122_v6 = vpack.i.bf16 %v593_v3, %v1491_v8 }
 0x2e3   : > { %614 = vrot.lane.b32.xlu1 %v571_v5, %s1325_s24  ;;  %v1147_v8 = vpack.i.bf16 %v571_v5, %v593_v3 }
 0x2e4   : > { %1123 = vrot.lane.b32.xlu0 %v1122_v6, %s1325_s24  ;;  %1128 = vrot.lane.b32.xlu2 %v1127_v7, %s1326_s25 }
 0x2e9   : > { %v689_v10 = vld [vmem:[#allocation2 + $0x18] sm:$0xff]  ;;  %v1119_v4 = vpop.permute.xlu1 %1118 }
 0x2ea   : > { %v1121_v15 = vunpack.i.h.bf16 %v1119_v4  ;;  %v1120_v13 = vunpack.i.l.bf16 %v1119_v4 }
 0x2eb   : > { %1143 = vrot.lane.b32.xlu1 %v1142_v14, %s1326_s25 }
 0x2ec   : > { %1133 = vrot.lane.b32.xlu0 %v1132_v9, %s1326_s25  ;;  %709 = vrot.lane.b32.xlu2 %v689_v10, %s1326_s25  ;;  %v631_v27 = vsel %vm334_vm4, %v1120_v13, %v1121_v15 }
 0x2f3   : > { %1148 = vrot.lane.b32.xlu1 %v1147_v8, %s1326_s25 }
 0x336   : > { %v1114_v11 = vpop.permute.xlu2 %1113 }
 0x337   : > { %v1116_v18 = vunpack.i.h.bf16 %v1114_v11  ;;  %v1115_v20 = vunpack.i.l.bf16 %v1114_v11 }
 0x339   : > { %v630_v26 = vsel %vm334_vm4, %v1116_v18, %v1120_v13 }
 0x33e   : > { %v1129_v35 = vpop.permute.xlu2 %1128 }
 0x33f   : > { %v1130_v37 = vunpack.i.l.bf16 %v1129_v35  ;;  %v1131_v41 = vunpack.i.h.bf16 %v1129_v35 }
 0x346   : > { %v710_v52 = vpop.permute.xlu2 %709 }
 0x347   : > { %v1139_v16 = vpop.permute.xlu1 %1138 }
 0x348   : > { %v1141_v21 = vunpack.i.h.bf16 %v1139_v16  ;;  %v1140_v23 = vunpack.i.l.bf16 %v1139_v16 }
 0x34a   : > { %v632_v22 = vsel %vm334_vm4, %v1140_v23, %v1141_v21  ;;  %v633_v25 = vsel %vm334_vm4, %v1141_v21, %v1115_v20 }
 0x34b   : > { %656 = vmatpush.msrb.mxu2 %v632_v22  ;;  %676 = vmatpush.msrb.mxu3 %v633_v25 }
 0x34d   : > { %657 = vmatpush.msrb.mxu2 %v630_v26  ;;  %677 = vmatpush.msrb.mxu3 %v631_v27 }
 0x355   : > { %v615_v28 = vpop.permute.xlu1 %614 }
 0x356   : > { %v1124_v29 = vpop.permute.xlu0 %1123 }
 0x357   : > { %v1126_v30 = vunpack.i.h.bf16 %v1124_v29  ;;  %v1125_v31 = vunpack.i.l.bf16 %v1124_v29 }
 0x359   : > { %v628_v33 = vsel %vm334_vm4, %v1125_v31, %v1126_v30  ;;  %v629_v34 = vsel %vm334_vm4, %v1126_v30, %v615_v28 }
 0x35a   : > { %658 = vmatpush.msrb.mxu2 %v628_v33  ;;  %678 = vmatpush.msrb.mxu3 %v629_v34 }
 0x35b   : > { %986 = vmatmul.msk.f32.vlgmr.msrb.gmra.mxu3 %vm347_vm5, %v591_v32  ;;  %985 = vmatmul.msk.f32.vlgmr.msrb.gmra.mxu2 %vm347_vm5, %v591_v32 }
 0x35c   : > { %796 = vmatpush.msra.mxu2 %v584_v59  ;;  %816 = vmatpush.msra.mxu3 %v600_v62 }
 0x35d   : > { %v1144_v36 = vpop.permute.xlu1 %1143 }
 0x35e   : > { %797 = vmatpush.msra.mxu2 %v1567_v53  ;;  %v1134_v38 = vpop.permute.xlu0 %1133  ;;  %817 = vmatpush.msra.mxu3 %v1569_v54  ;;  %v1146_v39 = vunpack.i.h.bf16 %v1144_v36  ;;  %v1145_v40 = vunpack.i.l.bf16 %v1144_v36  ;;  %v686_v53 = vld [vmem:[#allocation8 + $0x10] sm:$0xff] }
 0x35f   : > { %v1136_v42 = vunpack.i.h.bf16 %v1134_v38  ;;  %v1135_v43 = vunpack.i.l.bf16 %v1134_v38 }
 0x360   : > { %798 = vmatpush.msra.mxu2 %v593_v3  ;;  %818 = vmatpush.msra.mxu3 %v571_v5  ;;  %v727_v45 = vsel %vm431_vm6, %v1145_v40, %v1146_v39  ;;  %v728_v46 = vsel %vm431_vm6, %v1146_v39, %v1130_v37 }
 0x361   : > { %751 = vmatpush.msra.mxu0 %v727_v45  ;;  %771 = vmatpush.msra.mxu1 %v728_v46  ;;  %v725_v47 = vsel %vm431_vm6, %v1131_v41, %v1135_v43  ;;  %v726_v48 = vsel %vm431_vm6, %v1135_v43, %v1136_v42 }
 0x363   : > { %990 = vmatmul.msk.f32.vlgmr.msra.gmra.mxu3 %vm347_vm5, %v684_v44  ;;  %752 = vmatpush.msra.mxu0 %v725_v47 }
 0x364   : > { %989 = vmatmul.msk.f32.vlgmr.msra.gmra.mxu2 %vm347_vm5, %v684_v44  ;;  %772 = vmatpush.msra.mxu1 %v726_v48 }
 0x365   : > { %v1149_v49 = vpop.permute.xlu1 %1148 }
 0x366   : > { %v1151_v50 = vunpack.i.h.bf16 %v1149_v49  ;;  %v1150_v51 = vunpack.i.l.bf16 %v1149_v49 }
 0x368   : > { %v723_v54 = vsel %vm431_vm6, %v1150_v51, %v1151_v50  ;;  %v724_v55 = vsel %vm431_vm6, %v1151_v50, %v710_v52 }
 0x369   : > { %753 = vmatpush.msra.mxu0 %v723_v54  ;;  %773 = vmatpush.msra.mxu1 %v724_v55 }
 0x36a   : > { %987 = vmatmul.msk.f32.vlgmr.msra.gmra.mxu0 %vm347_vm5, %v686_v53  ;;  %988 = vmatmul.msk.f32.vlgmr.msra.gmra.mxu1 %vm347_vm5, %v686_v53 }
 0x3de   : > { %v680_v56 = vpop.f32.mrf.mxu3  ;;  %v660_v57 = vpop.f32.mrf.mxu2 }
 0x3df   : > { %v779_v58 = vsel %vm1553_vm9, 0.0, %v680_v56  ;;  %v778_v60 = vsel %vm1543_vm7, 0.0, %v660_v57 }
 0x3e6   : > { %v820_v59 = vpop.f32.mrf.mxu3 }
 0x3e7   : > { %v800_v61 = vpop.f32.mrf.mxu2  ;;  %v821_v62 = vadd.f32 %v820_v59, %v779_v58  ;;  %v755_v63 = vpop.f32.mrf.mxu0 }
 0x3e8   : > { %v801_v0 = vadd.f32 %v800_v61, %v778_v60  ;;  %v823_v3 = vsel %vm1549_vm8, 0.0, %v755_v63  ;;  %v775_v5 = vpop.f32.mrf.mxu1 }
 0x3e9   : > { %v824_v6 = vsel %vm1559_vm10, 0.0, %v775_v5 }
 0x3ea   : > { %v825_v7 = vadd.f32 %v823_v3, %v801_v0  ;;  %v826_v14 = vadd.f32 %v824_v6, %v821_v62 }
 0x3ec   : > { %v827_v9 = vadd.f32 %v826_v14, %v825_v7  ;;  %v830_v19 = vmul.f32 %v825_v7, %v825_v7  ;;  %v831_v10 = vmul.f32 %v826_v14, %v826_v14 }
 0x3ee   : > { %828 = vadd.xlane.f32.xlu0 %v827_v9  ;;  %v832_v8 = vadd.f32 %v831_v10, %v830_v19 }
 0x3f0   : > { %833 = vadd.xlane.f32.xlu1 %v832_v8 }
 0x461   : > { %v829_v12 = vpop.xlane.xlu0 %828 }
 0x462   : > { %v835_v4 = vmul.f32 0.00390625, %v829_v12 }
 0x463   : > { %v834_v11 = vpop.xlane.xlu1 %833 }
 0x464   : > { %v836_v15 = vmul.f32 0.00390625, %v834_v11  ;;  %v837_v13 = vmul.f32 %v835_v4, %v835_v4  ;;  %v839_v25 = vsub.f32 %v825_v7, %v835_v4  ;;  %v840_v26 = vsub.f32 %v826_v14, %v835_v4 }
 0x466   : > { %v838_v17 = vsub.f32 %v836_v15, %v837_v13 }
 0x468   : > { %v841_v16 = vadd.f32 1e-05, %v838_v17 }
 0x46a   : > { %1154 = vrsqrt.f32 %v841_v16  ;;  %vm848_vm15 = vweird.f32 %v841_v16 }
 0x470   : > { %v1155_v18 = vpop.eup %1154 }
 0x471   : > { %v843_v24 = vmul.f32 %v1155_v18, %v841_v16  ;;  %vm849_vm14 = vweird.f32 %v1155_v18 }
 0x472   : > { %vm850_vm0 = vmor %vm848_vm15, %vm849_vm14 }
 0x473   : > { %v844_v20 = vmul.f32 %v1155_v18, %v843_v24 }
 0x475   : > { %v845_v21 = vmul.f32 0.5, %v844_v20 }
 0x477   : > { %v846_v23 = vsub.f32 1.5, %v845_v21 }
 0x479   : > { %v847_v22 = vmul.f32 %v1155_v18, %v846_v23 }
 0x47b   : > { %v851_v27 = vsel %vm850_vm0, %v1155_v18, %v847_v22 }
 0x47c   : > { %v852_v28 = vmul.f32 %v851_v27, %v839_v25  ;;  %v853_v29 = vmul.f32 %v851_v27, %v840_v26 }
 0x47e   : > { %v854_v30 = vadd.f32 %v852_v28, %v1465_v1  ;;  %v855_v31 = vadd.f32 %v853_v29, %v1475_v2 }
 0x480   : > { %v856_v32 = vmax.f32 %v854_v30, 0.0  ;;  %v857_v33 = vmax.f32 %v855_v31, 0.0 }
 0x482   : > { %858 = vst [vmem:[%s221_s19] sm:$0xff] %v856_v32 }
 0x483   : > { %859 = vst [vmem:[%s221_s19 + $0x8] sm:$0xff] %v857_v33 }
 0x484   : > { %1273 = shalt.err (!%p1270_p9)
}
 0x485   : > { %1008 = dma.vmem_to_hbm [thread:$0]  (%p1416_p4), %s875_s30, 256, %s877_s5, %s861_s6  }
 0x486 PF: > { %s888_s10 = sand.u32 1, %s1304_s12   ;;  %p1686_p10 = scmp.ge.s32.totalorder %s1316_s15, 2 }
 0x487   : > { %s889_s9 = scalar_lea.sflag [#allocation5], %s888_s10 }
 0x488   : > { %p1022_p13 = pnand %p1686_p10, %p1420_p6 }
 0x48a   : > { %p1023_p11 = pneg %p1022_p13 }
 0x48c   : > { %1299 = dma.done.wait (%p1023_p11), %s889_s9, 256  }
 0x48d   : > { %1301 = vsyncadd (%p1023_p11), %s889_s9, 4294967040  ;;  %p17_p0 = scmp.ge.s32.totalorder %s1390_s4, 4   ;;  %s1687_s12 = smov %s1308_s13 }
 0x48e   : > { %s1688_s13 = smov %s1312_s14  ;;  %s1689_s14 = smov %s1401_s7 }
 0x48f   : > { %s1690_s15 = smov %s1390_s4  ;;  %19 = sbr.rel (!%p17_p0) target bundleno = 6 (0x6), region = 89 }
 0x494   :  { %895 = vsyncpa [#allocation4], 1 }
 0x495   :  { %897 = vsyncpa [#allocation4 + $0x1], 1 }
 0x496   :  { %898 = vsyncpa [#allocation7], 1 }
 0x497   :  { %899 = vsyncpa [#allocation5], 1 }
 0x498   :  { %901 = vsyncpa [#allocation5 + $0x1], 1 }

</bundles_post_ra>
